<compile_context>
chip_gen: v7x
topology: tpu7x:2x2x1
jax: 0.10.0
libtpu: 0.0.40
codegen_flags: <defaults>
</compile_context>

<pallas_src>
import numpy as np
import jax
import jax.numpy as jnp
from jax.experimental import pallas as pl
from jax.experimental.pallas import tpu as pltpu

LANE = 128          # lane-dense padding width for narrow output projections
_EPS = 1e-12        # ESPnet LayerNorm eps


# ------------------------------------------------------------------ pallas_call helper
def _vmem_call(kernel, out_shape, *args):
    """Whole-array pallas_call: every operand of the fused kernel resident in VMEM."""
    return pl.pallas_call(
        kernel,
        out_shape=out_shape,
        in_specs=[pl.BlockSpec(memory_space=pltpu.MemorySpace.VMEM) for _ in args],
        out_specs=pl.BlockSpec(memory_space=pltpu.MemorySpace.VMEM),
        compiler_params=pltpu.CompilerParams(vmem_limit_bytes=32 * 1024 * 1024),
    )(*args)


# ------------------------------------------------------------- in-kernel value helpers
def _ln(x, g, b):
    mu = jnp.mean(x, axis=-1, keepdims=True)
    var = jnp.mean(jnp.square(x - mu), axis=-1, keepdims=True)
    return (x - mu) * jax.lax.rsqrt(var + _EPS) * g + b


def _conv1d_im2col(x, w, b, ksize, relu):
    """'same' 1-D conv over time as ONE matmul.  x: (T, Cin) f32, w: (K*Cin, Cout) bf16."""
    T, C = x.shape
    pad_l = (ksize - 1) // 2
    pad_r = ksize - 1 - pad_l
    parts = []
    if pad_l:
        parts.append(jnp.zeros((pad_l, C), x.dtype))
    parts.append(x)
    if pad_r:
        parts.append(jnp.zeros((pad_r, C), x.dtype))
    xp = jnp.concatenate(parts, axis=0)                                       # (T+K-1, Cin)
    im = jnp.concatenate([xp[k:k + T, :] for k in range(ksize)], axis=-1)     # (T, K*Cin)
    y = jnp.dot(im.astype(jnp.bfloat16), w, preferred_element_type=jnp.float32) + b
    return jnp.maximum(y, 0.0) if relu else y


# --------------------------------------------------------------------- fused kernels
def _make_layer_kernel(heads, ksize):
    """Fused ESPnet EncoderLayer (normalize_before=True, MultiLayeredConv1d FFN), eval."""

    def kern(x_ref, wqkv_ref, bqkv_ref, wo_ref, bo_ref,
             ln1g_ref, ln1b_ref, ln2g_ref, ln2b_ref,
             w1_ref, b1_ref, w2_ref, b2_ref, o_ref):
        x = x_ref[...]                                       # (T, D) f32
        T, D = x.shape
        dk = D // heads
        scale = 1.0 / float(np.sqrt(dk))

        # ---- self-attention sub-layer ----------------------------------------------
        xn = _ln(x, ln1g_ref[...], ln1b_ref[...])
        qkv = jnp.dot(xn.astype(jnp.bfloat16), wqkv_ref[...],
                      preferred_element_type=jnp.float32) + bqkv_ref[...]     # (T, 3D)
        qkv16 = qkv.astype(jnp.bfloat16)
        # head-major (H, T, dk) views of Q / K / V (static lane slices + stack)
        q = jnp.stack([qkv16[:, h * dk:(h + 1) * dk] for h in range(heads)], axis=0)
        k = jnp.stack([qkv16[:, D + h * dk:D + (h + 1) * dk] for h in range(heads)], axis=0)
        v = jnp.stack([qkv16[:, 2 * D + h * dk:2 * D + (h + 1) * dk] for h in range(heads)], axis=0)
        # batched scores / softmax / context (no mask: inference, B=1, no padding)
        s = jnp.einsum("hqd,hkd->hqk", q, k,
                       preferred_element_type=jnp.float32) * scale           # (H, T, T)
        s = s - jnp.max(s, axis=-1, keepdims=True)
        e = jnp.exp(s)
        p = e * pl.reciprocal(jnp.sum(e, axis=-1, keepdims=True), approx=True)
        ctx = jnp.einsum("hqk,hkd->hqd", p.astype(jnp.bfloat16), v,
                         preferred_element_type=jnp.float32)                 # (H, T, dk)
        att = jnp.concatenate([ctx[h] for h in range(heads)], axis=-1)       # (T, D)
        x = x + jnp.dot(att.astype(jnp.bfloat16), wo_ref[...],
                        preferred_element_type=jnp.float32) + bo_ref[...]

        # ---- positionwise conv1d FFN sub-layer ---------------------------------------
        xn2 = _ln(x, ln2g_ref[...], ln2b_ref[...])
        h1 = _conv1d_im2col(xn2, w1_ref[...], b1_ref[...], ksize, relu=True)
        h2 = _conv1d_im2col(h1, w2_ref[...], b2_ref[...], ksize, relu=False)
        o_ref[...] = x + h2

    return kern


def transformer_layer(x, p, heads, ksize):
    T, D = x.shape
    return _vmem_call(
        _make_layer_kernel(heads, ksize),
        jax.ShapeDtypeStruct((T, D), jnp.float32),
        x, p["wqkv"], p["bqkv"], p["wo"], p["bo"],
        p["ln1_g"], p["ln1_b"], p["ln2_g"], p["ln2_b"],
        p["ff_w1"], p["ff_b1"], p["ff_w2"], p["ff_b2"],
    )


def _ln_kernel(x_ref, g_ref, b_ref, o_ref):
    o_ref[...] = _ln(x_ref[...], g_ref[...], b_ref[...])


def layer_norm(x, g, b):
    return _vmem_call(_ln_kernel, jax.ShapeDtypeStruct(x.shape, jnp.float32), x, g, b)


def _make_varpred_kernel(n_layers, ksize):
    """Fused DurationPredictor-style stack: [Conv1d+ReLU+LayerNorm] * n_layers + Linear."""

    def kern(*refs):
        x_ref, o_ref = refs[0], refs[-1]
        w = refs[1:-1]
        h = x_ref[...]
        for l in range(n_layers):
            cw, cb, g, beta = (r[...] for r in w[4 * l:4 * l + 4])
            h = _conv1d_im2col(h, cw, cb, ksize, relu=True)
            h = _ln(h, g, beta)
        lw, lb = w[4 * n_layers][...], w[4 * n_layers + 1][...]
        o_ref[...] = jnp.dot(h.astype(jnp.bfloat16), lw,
                             preferred_element_type=jnp.float32) + lb

    return kern


def variance_predictor(x, p, ksize):
    """x: (T, adim) -> per-frame scalar prediction (T,).  Output lane-padded to 128."""
    T = x.shape[0]
    args = [x]
    for c in p["convs"]:
        args += [c["w"], c["b"], c["g"], c["beta"]]
    args += [p["lin_w"], p["lin_b"]]
    out = _vmem_call(_make_varpred_kernel(len(p["convs"]), ksize),
                     jax.ShapeDtypeStruct((T, LANE), jnp.float32), *args)
    return out[:, 0]


def _dec_input_kernel(hs_ref, pr_ref, pb_ref, er_ref, eb_ref,
                      w_ref, b_ref, g_ref, beta_ref, pe_ref, o_ref):
    # hs + pitch_embed + energy_embed, then decoder input layer: Linear -> LN -> ReLU -> +alpha*pe
    h = hs_ref[...] + pr_ref[...] + pb_ref[...] + er_ref[...] + eb_ref[...]
    z = jnp.dot(h.astype(jnp.bfloat16), w_ref[...],
                preferred_element_type=jnp.float32) + b_ref[...]
    z = jnp.maximum(_ln(z, g_ref[...], beta_ref[...]), 0.0)
    o_ref[...] = z + pe_ref[...]


def decoder_input(hs, p_rows, p_b, e_rows, e_b, w, b, g, beta, pe_scaled):
    L, D = hs.shape[0], w.shape[1]
    return _vmem_call(_dec_input_kernel, jax.ShapeDtypeStruct((L, D), jnp.float32),
                      hs, p_rows, p_b, e_rows, e_b, w, b, g, beta, pe_scaled)


def _final_kernel(z_ref, g_ref, b_ref, w_ref, bo_ref, o_ref):
    z = _ln(z_ref[...], g_ref[...], b_ref[...])                 # decoder after_norm
    o_ref[...] = jnp.dot(z.astype(jnp.bfloat16), w_ref[...],    # feat_out (lane-padded)
                         preferred_element_type=jnp.float32) + bo_ref[...]


def final_projection(zs, g, b, w, bo):
    L = zs.shape[0]
    return _vmem_call(_final_kernel, jax.ShapeDtypeStruct((L, LANE), jnp.float32),
                      zs, g, b, w, bo)


# ------------------------------------------------------------------------------ glue
def sinusoid_pe(T, d):
    pos = np.arange(T, dtype=np.float32)[:, None]
    div = np.exp(np.arange(0, d, 2, dtype=np.float32) * -(np.log(10000.0) / d))
    pe = np.zeros((T, d), np.float32)
    pe[:, 0::2] = np.sin(pos * div)
    pe[:, 1::2] = np.cos(pos * div)
    return jnp.asarray(pe)


def embed_rows(vals, vmin, vmax, n_bins, W):
    """bucketize -> row gather of the embed Linear weight (== one_hot @ W, bias added later)."""
    # NOTE: jnp.digitize and torch.bucketize differ on values exactly at a bin edge.
    bins = jnp.linspace(vmin, vmax, n_bins - 1)
    idx = jnp.clip(jnp.digitize(vals, bins), 0, n_bins - 1)
    return W[idx]


# -------------------------------------------------------------------------- parameters
def init_params(key, hp):
    kc = iter(jax.random.split(key, 256))

    def nrm(shape, scale=0.1, dtype=jnp.bfloat16):
        return (scale * jax.random.normal(next(kc), shape, jnp.float32)).astype(dtype)

    def zeros(shape, dtype=jnp.float32):
        return jnp.zeros(shape, dtype)

    def ones(shape, dtype=jnp.float32):
        return jnp.ones(shape, dtype)

    adim, ddim, K = hp["adim"], hp["ddim"], hp["pw_ksize"]

    def tf_layer(d, units):
        return dict(
            ln1_g=ones((1, d)), ln1_b=zeros((1, d)),
            wqkv=nrm((d, 3 * d)), bqkv=zeros((1, 3 * d)),        # fused Q|K|V
            wo=nrm((d, d)), bo=zeros((1, d)),
            ln2_g=ones((1, d)), ln2_b=zeros((1, d)),
            ff_w1=nrm((K * d, units)), ff_b1=zeros((1, units)),  # im2col layout (K*Cin, Cout)
            ff_w2=nrm((K * units, d)), ff_b2=zeros((1, d)),
        )

    def var_pred(in_dim, chans, layers, ksize, lin_bias=0.0):
        convs, c_in = [], in_dim
        for _ in range(layers):
            convs.append(dict(w=nrm((ksize * c_in, chans)), b=zeros((1, chans)),
                              g=ones((1, chans)), beta=zeros((1, chans))))
            c_in = chans
        lin_w = jnp.zeros((chans, LANE), jnp.bfloat16).at[:, 0].set(nrm((chans,)))
        lin_b = jnp.zeros((1, LANE), jnp.float32).at[0, 0].set(lin_bias)
        return dict(convs=convs, lin_w=lin_w, lin_b=lin_b)

    emb = nrm((hp["idim"], adim), dtype=jnp.float32)
    emb = emb.at[0].set(0.0)                                     # padding_idx = 0

    n_out = hp["odim"] * hp["reduction_factor"]
    feat_out_w = jnp.zeros((ddim, LANE), jnp.bfloat16).at[:, :n_out].set(nrm((ddim, n_out)))
    feat_out_b = zeros((1, LANE))

    return dict(
        emb=emb,
        enc_alpha=jnp.float32(1.0), dec_alpha=jnp.float32(1.0),  # ScaledPositionalEncoding
        enc_layers=[tf_layer(adim, hp["eunits"]) for _ in range(hp["elayers"])],
        enc_norm_g=ones((1, adim)), enc_norm_b=zeros((1, adim)),
        dur=var_pred(adim, hp["dp_chans"], hp["dp_layers"], hp["dp_ksize"], lin_bias=1.0),
        energy=var_pred(adim, hp["dp_chans"], hp["dp_layers"], hp["dp_ksize"]),
        pitch=var_pred(adim, hp["dp_chans"], hp["dp_layers"], hp["dp_ksize"]),
        energy_embed_w=nrm((adim, adim), dtype=jnp.float32), energy_embed_b=zeros((1, adim)),
        pitch_embed_w=nrm((adim, adim), dtype=jnp.float32), pitch_embed_b=zeros((1, adim)),
        dec_in_w=nrm((adim, ddim)), dec_in_b=zeros((1, ddim)),
        dec_in_ln_g=ones((1, ddim)), dec_in_ln_b=zeros((1, ddim)),
        dec_layers=[tf_layer(ddim, hp["dunits"]) for _ in range(hp["dlayers"])],
        dec_norm_g=ones((1, ddim)), dec_norm_b=zeros((1, ddim)),
        feat_out_w=feat_out_w, feat_out_b=feat_out_b,
    )


# ---------------------------------------------------------------------------- forward
def ffn_transformer_inference(x_ids, params, hp):
    """Mirrors FeedForwardTransformer._forward(..., is_inference=True) for B=1."""
    T = x_ids.shape[0]
    adim, ddim = hp["adim"], hp["ddim"]
    heads, K, dK = hp["aheads"], hp["pw_ksize"], hp["dp_ksize"]

    # --- encoder: Embedding -> ScaledPositionalEncoding -> fused blocks -> after_norm
    hs = params["emb"][x_ids] + params["enc_alpha"] * sinusoid_pe(T, adim)
    for lyr in params["enc_layers"]:
        hs = transformer_layer(hs, lyr, heads, K)
    hs = layer_norm(hs, params["enc_norm_g"], params["enc_norm_b"])

    # --- duration predictor inference: clamp(round(exp(x) - 1), min=0)
    d_pred = variance_predictor(hs, params["dur"], dK)
    d = np.asarray(jnp.clip(jnp.round(jnp.exp(d_pred) - 1.0), 0)).astype(np.int64)
    if d.sum() == 0:
        d = np.ones_like(d)                                      # LengthRegulator guard
    # TODO(synk): length regulator runs host-side (data-dependent output length); move it
    #             on-device with a static max-L + scalar-prefetch gather to enable e2e jit.
    idx = np.repeat(np.arange(T), d)
    hs = hs[jnp.asarray(idx)]                                    # (L, adim)
    L = hs.shape[0]

    # --- energy / pitch predictors -> bucketize -> embedding-weight row gather
    e_pred = variance_predictor(hs, params["energy"], dK)
    p_pred = variance_predictor(hs, params["pitch"], dK)
    p_rows = embed_rows(p_pred, hp["p_min"], hp["p_max"], adim, params["pitch_embed_w"])
    e_rows = embed_rows(e_pred, hp["e_min"], hp["e_max"], adim, params["energy_embed_w"])

    # --- decoder input: (+embeds) -> Linear -> LN -> ReLU -> +alpha*pe, one fused kernel
    pe_dec = params["dec_alpha"] * sinusoid_pe(L, ddim)
    zs = decoder_input(hs, p_rows, params["pitch_embed_b"], e_rows, params["energy_embed_b"],
                       params["dec_in_w"], params["dec_in_b"],
                       params["dec_in_ln_g"], params["dec_in_ln_b"], pe_dec)
    for lyr in params["dec_layers"]:
        zs = transformer_layer(zs, lyr, heads, K)

    # --- decoder after_norm + feat_out fused; postnet_layers == 0 -> after == before
    out = final_projection(zs, params["dec_norm_g"], params["dec_norm_b"],
                           params["feat_out_w"], params["feat_out_b"])
    n_out = hp["odim"] * hp["reduction_factor"]
    before = out[:, :n_out].reshape(-1, hp["odim"])              # (L*r, odim), r=1
    after = before
    return before, after, jnp.asarray(d)


# ------------------------------------------------------------------------------- main
if __name__ == "__main__":
    hp = dict(
        idim=40, odim=20,                 # vocab size, n_mels
        adim=32, aheads=2, eunits=64, elayers=1,
        ddim=32, dunits=64, dlayers=1, pw_ksize=3,
        dp_layers=2, dp_chans=32, dp_ksize=3,
        reduction_factor=1,
        e_min=0.0, e_max=2.0, p_min=80.0, p_max=400.0,
    )
    key = jax.random.PRNGKey(0)
    pkey, xkey = jax.random.split(key)
    params = init_params(pkey, hp)

    T = 8
    x_ids = jax.random.randint(xkey, (T,), minval=1, maxval=hp["idim"], dtype=jnp.int32)

    before_outs, after_outs, d_outs = ffn_transformer_inference(x_ids, params, hp)
    jax.block_until_ready(after_outs)
    assert after_outs.shape[-1] == hp["odim"]
    assert after_outs.shape[0] == int(np.asarray(d_outs).sum())
    print("KERNEL_OK")
</pallas_src>

<mosaic_0001>
module attributes {stable_mosaic.version = 11 : i64} {
  func.func @kern(%arg0: memref<8x32xf32, #tpu.memory_space<vmem>>, %arg1: memref<32x96xbf16, #tpu.memory_space<vmem>>, %arg2: memref<1x96xf32, #tpu.memory_space<vmem>>, %arg3: memref<32x32xbf16, #tpu.memory_space<vmem>>, %arg4: memref<1x32xf32, #tpu.memory_space<vmem>>, %arg5: memref<1x32xf32, #tpu.memory_space<vmem>>, %arg6: memref<1x32xf32, #tpu.memory_space<vmem>>, %arg7: memref<1x32xf32, #tpu.memory_space<vmem>>, %arg8: memref<1x32xf32, #tpu.memory_space<vmem>>, %arg9: memref<96x64xbf16, #tpu.memory_space<vmem>>, %arg10: memref<1x64xf32, #tpu.memory_space<vmem>>, %arg11: memref<192x32xbf16, #tpu.memory_space<vmem>>, %arg12: memref<1x32xf32, #tpu.memory_space<vmem>>, %arg13: memref<8x32xf32, #tpu.memory_space<vmem>>) attributes {dimension_semantics = [], scalar_prefetch = 0 : i64, scratch_operands = 0 : i64, tpu.core_type = #tpu.core_type<tc>} {
    %c0 = arith.constant 0 : index
    %c0_0 = arith.constant 0 : index
    %0 = vector.load %arg0[%c0, %c0_0] : memref<8x32xf32, #tpu.memory_space<vmem>>, vector<8x32xf32>
    %c0_1 = arith.constant 0 : index
    %c0_2 = arith.constant 0 : index
    %1 = vector.load %arg5[%c0_1, %c0_2] : memref<1x32xf32, #tpu.memory_space<vmem>>, vector<1x32xf32>
    %c0_3 = arith.constant 0 : index
    %c0_4 = arith.constant 0 : index
    %2 = vector.load %arg6[%c0_3, %c0_4] : memref<1x32xf32, #tpu.memory_space<vmem>>, vector<1x32xf32>
    %cst = arith.constant dense<0.000000e+00> : vector<8xf32>
    %3 = vector.multi_reduction <add>, %0, %cst [1] : vector<8x32xf32> to vector<8xf32>
    %4 = vector.shape_cast %3 : vector<8xf32> to vector<8x1xf32>
    %cst_5 = arith.constant 3.200000e+01 : f32
    %5 = vector.broadcast %cst_5 : f32 to vector<8x1xf32>
    %6 = arith.divf %4, %5 : vector<8x1xf32>
    %7 = vector.broadcast %6 : vector<8x1xf32> to vector<8x32xf32>
    %8 = arith.subf %0, %7 : vector<8x32xf32>
    %9 = arith.mulf %8, %8 : vector<8x32xf32>
    %cst_6 = arith.constant dense<0.000000e+00> : vector<8xf32>
    %10 = vector.multi_reduction <add>, %9, %cst_6 [1] : vector<8x32xf32> to vector<8xf32>
    %11 = vector.shape_cast %10 : vector<8xf32> to vector<8x1xf32>
    %cst_7 = arith.constant 3.200000e+01 : f32
    %12 = vector.broadcast %cst_7 : f32 to vector<8x1xf32>
    %13 = arith.divf %11, %12 : vector<8x1xf32>
    %14 = vector.broadcast %6 : vector<8x1xf32> to vector<8x32xf32>
    %15 = arith.subf %0, %14 : vector<8x32xf32>
    %cst_8 = arith.constant 9.99999996E-13 : f32
    %16 = vector.broadcast %cst_8 : f32 to vector<8x1xf32>
    %17 = arith.addf %13, %16 : vector<8x1xf32>
    %18 = math.rsqrt %17 : vector<8x1xf32>
    %19 = vector.broadcast %18 : vector<8x1xf32> to vector<8x32xf32>
    %20 = arith.mulf %15, %19 : vector<8x32xf32>
    %21 = vector.broadcast %1 : vector<1x32xf32> to vector<8x32xf32>
    %22 = arith.mulf %20, %21 : vector<8x32xf32>
    %23 = vector.broadcast %2 : vector<1x32xf32> to vector<8x32xf32>
    %24 = arith.addf %22, %23 : vector<8x32xf32>
    %25 = arith.truncf %24 : vector<8x32xf32> to vector<8x32xbf16>
    %c0_9 = arith.constant 0 : index
    %c0_10 = arith.constant 0 : index
    %26 = vector.load %arg1[%c0_9, %c0_10] : memref<32x96xbf16, #tpu.memory_space<vmem>>, vector<32x96xbf16>
    %cst_11 = arith.constant dense<0.000000e+00> : vector<8x96xf32>
    %27 = tpu.matmul %25, %26, %cst_11 {dimension_numbers = #tpu.dot_dimension_numbers<[1], [0], [0], [1], [0, 0, 1, 1], [], []>} : vector<8x32xbf16>, vector<32x96xbf16>, vector<8x96xf32> -> vector<8x96xf32>
    %c0_12 = arith.constant 0 : index
    %c0_13 = arith.constant 0 : index
    %28 = vector.load %arg2[%c0_12, %c0_13] : memref<1x96xf32, #tpu.memory_space<vmem>>, vector<1x96xf32>
    %29 = vector.broadcast %28 : vector<1x96xf32> to vector<8x96xf32>
    %30 = arith.addf %27, %29 : vector<8x96xf32>
    %31 = arith.truncf %30 : vector<8x96xf32> to vector<8x96xbf16>
    %32 = vector.extract_strided_slice %31 {offsets = [0, 0], sizes = [8, 16], strides = [1, 1]} : vector<8x96xbf16> to vector<8x16xbf16>
    %33 = vector.extract_strided_slice %31 {offsets = [0, 16], sizes = [8, 16], strides = [1, 1]} : vector<8x96xbf16> to vector<8x16xbf16>
    %34 = vector.shape_cast %32 : vector<8x16xbf16> to vector<1x8x16xbf16>
    %35 = vector.shape_cast %33 : vector<8x16xbf16> to vector<1x8x16xbf16>
    %36 = tpu.concatenate %34, %35 in 0 : vector<1x8x16xbf16>, vector<1x8x16xbf16> -> vector<2x8x16xbf16>
    %37 = vector.extract_strided_slice %31 {offsets = [0, 32], sizes = [8, 16], strides = [1, 1]} : vector<8x96xbf16> to vector<8x16xbf16>
    %38 = vector.extract_strided_slice %31 {offsets = [0, 48], sizes = [8, 16], strides = [1, 1]} : vector<8x96xbf16> to vector<8x16xbf16>
    %39 = vector.shape_cast %37 : vector<8x16xbf16> to vector<1x8x16xbf16>
    %40 = vector.shape_cast %38 : vector<8x16xbf16> to vector<1x8x16xbf16>
    %41 = tpu.concatenate %39, %40 in 0 : vector<1x8x16xbf16>, vector<1x8x16xbf16> -> vector<2x8x16xbf16>
    %42 = vector.extract_strided_slice %31 {offsets = [0, 64], sizes = [8, 16], strides = [1, 1]} : vector<8x96xbf16> to vector<8x16xbf16>
    %43 = vector.extract_strided_slice %31 {offsets = [0, 80], sizes = [8, 16], strides = [1, 1]} : vector<8x96xbf16> to vector<8x16xbf16>
    %44 = vector.shape_cast %42 : vector<8x16xbf16> to vector<1x8x16xbf16>
    %45 = vector.shape_cast %43 : vector<8x16xbf16> to vector<1x8x16xbf16>
    %46 = tpu.concatenate %44, %45 in 0 : vector<1x8x16xbf16>, vector<1x8x16xbf16> -> vector<2x8x16xbf16>
    "tpu.trace_start"() <{level = 10 : i32, message = "hqd,hkd->hqk"}> : () -> ()
    %cst_14 = arith.constant dense<0.000000e+00> : vector<2x8x8xf32>
    %47 = tpu.matmul %36, %41, %cst_14 {dimension_numbers = #tpu.dot_dimension_numbers<[2], [2], [1], [1], [0, 0, 0, 1, 1, 1], [0], [0]>} : vector<2x8x16xbf16>, vector<2x8x16xbf16>, vector<2x8x8xf32> -> vector<2x8x8xf32>
    "tpu.trace_stop"() : () -> ()
    %cst_15 = arith.constant 2.500000e-01 : f32
    %48 = vector.broadcast %cst_15 : f32 to vector<2x8x8xf32>
    %49 = arith.mulf %47, %48 : vector<2x8x8xf32>
    %cst_16 = arith.constant dense<0xFF800000> : vector<2x8xf32>
    %50 = vector.multi_reduction <maximumf>, %49, %cst_16 [2] : vector<2x8x8xf32> to vector<2x8xf32>
    %51 = vector.shape_cast %50 : vector<2x8xf32> to vector<2x8x1xf32>
    %52 = vector.broadcast %51 : vector<2x8x1xf32> to vector<2x8x8xf32>
    %53 = arith.subf %49, %52 : vector<2x8x8xf32>
    %54 = math.exp %53 : vector<2x8x8xf32>
    %cst_17 = arith.constant dense<0.000000e+00> : vector<2x8xf32>
    %55 = vector.multi_reduction <add>, %54, %cst_17 [2] : vector<2x8x8xf32> to vector<2x8xf32>
    %56 = vector.shape_cast %55 : vector<2x8xf32> to vector<2x8x1xf32>
    %57 = tpu.reciprocal %56 {approx = true} : vector<2x8x1xf32> -> vector<2x8x1xf32>
    %58 = vector.broadcast %57 : vector<2x8x1xf32> to vector<2x8x8xf32>
    %59 = arith.mulf %54, %58 : vector<2x8x8xf32>
    %60 = arith.truncf %59 : vector<2x8x8xf32> to vector<2x8x8xbf16>
    "tpu.trace_start"() <{level = 10 : i32, message = "hqk,hkd->hqd"}> : () -> ()
    %cst_18 = arith.constant dense<0.000000e+00> : vector<2x8x16xf32>
    %61 = tpu.matmul %60, %46, %cst_18 {dimension_numbers = #tpu.dot_dimension_numbers<[2], [1], [1], [2], [0, 0, 0, 1, 1, 2], [0], [0]>} : vector<2x8x8xbf16>, vector<2x8x16xbf16>, vector<2x8x16xf32> -> vector<2x8x16xf32>
    "tpu.trace_stop"() : () -> ()
    %62 = vector.extract_strided_slice %61 {offsets = [0, 0, 0], sizes = [1, 8, 16], strides = [1, 1, 1]} : vector<2x8x16xf32> to vector<1x8x16xf32>
    %63 = vector.shape_cast %62 : vector<1x8x16xf32> to vector<8x16xf32>
    %64 = vector.extract_strided_slice %61 {offsets = [1, 0, 0], sizes = [1, 8, 16], strides = [1, 1, 1]} : vector<2x8x16xf32> to vector<1x8x16xf32>
    %65 = vector.shape_cast %64 : vector<1x8x16xf32> to vector<8x16xf32>
    %66 = tpu.concatenate %63, %65 in 1 : vector<8x16xf32>, vector<8x16xf32> -> vector<8x32xf32>
    %67 = arith.truncf %66 : vector<8x32xf32> to vector<8x32xbf16>
    %c0_19 = arith.constant 0 : index
    %c0_20 = arith.constant 0 : index
    %68 = vector.load %arg3[%c0_19, %c0_20] : memref<32x32xbf16, #tpu.memory_space<vmem>>, vector<32x32xbf16>
    %cst_21 = arith.constant dense<0.000000e+00> : vector<8x32xf32>
    %69 = tpu.matmul %67, %68, %cst_21 {dimension_numbers = #tpu.dot_dimension_numbers<[1], [0], [0], [1], [0, 0, 1, 1], [], []>} : vector<8x32xbf16>, vector<32x32xbf16>, vector<8x32xf32> -> vector<8x32xf32>
    %70 = arith.addf %0, %69 : vector<8x32xf32>
    %c0_22 = arith.constant 0 : index
    %c0_23 = arith.constant 0 : index
    %71 = vector.load %arg4[%c0_22, %c0_23] : memref<1x32xf32, #tpu.memory_space<vmem>>, vector<1x32xf32>
    %72 = vector.broadcast %71 : vector<1x32xf32> to vector<8x32xf32>
    %73 = arith.addf %70, %72 : vector<8x32xf32>
    %c0_24 = arith.constant 0 : index
    %c0_25 = arith.constant 0 : index
    %74 = vector.load %arg7[%c0_24, %c0_25] : memref<1x32xf32, #tpu.memory_space<vmem>>, vector<1x32xf32>
    %c0_26 = arith.constant 0 : index
    %c0_27 = arith.constant 0 : index
    %75 = vector.load %arg8[%c0_26, %c0_27] : memref<1x32xf32, #tpu.memory_space<vmem>>, vector<1x32xf32>
    %cst_28 = arith.constant dense<0.000000e+00> : vector<8xf32>
    %76 = vector.multi_reduction <add>, %73, %cst_28 [1] : vector<8x32xf32> to vector<8xf32>
    %77 = vector.shape_cast %76 : vector<8xf32> to vector<8x1xf32>
    %cst_29 = arith.constant 3.200000e+01 : f32
    %78 = vector.broadcast %cst_29 : f32 to vector<8x1xf32>
    %79 = arith.divf %77, %78 : vector<8x1xf32>
    %80 = vector.broadcast %79 : vector<8x1xf32> to vector<8x32xf32>
    %81 = arith.subf %73, %80 : vector<8x32xf32>
    %82 = arith.mulf %81, %81 : vector<8x32xf32>
    %cst_30 = arith.constant dense<0.000000e+00> : vector<8xf32>
    %83 = vector.multi_reduction <add>, %82, %cst_30 [1] : vector<8x32xf32> to vector<8xf32>
    %84 = vector.shape_cast %83 : vector<8xf32> to vector<8x1xf32>
    %cst_31 = arith.constant 3.200000e+01 : f32
    %85 = vector.broadcast %cst_31 : f32 to vector<8x1xf32>
    %86 = arith.divf %84, %85 : vector<8x1xf32>
    %87 = vector.broadcast %79 : vector<8x1xf32> to vector<8x32xf32>
    %88 = arith.subf %73, %87 : vector<8x32xf32>
    %cst_32 = arith.constant 9.99999996E-13 : f32
    %89 = vector.broadcast %cst_32 : f32 to vector<8x1xf32>
    %90 = arith.addf %86, %89 : vector<8x1xf32>
    %91 = math.rsqrt %90 : vector<8x1xf32>
    %92 = vector.broadcast %91 : vector<8x1xf32> to vector<8x32xf32>
    %93 = arith.mulf %88, %92 : vector<8x32xf32>
    %94 = vector.broadcast %74 : vector<1x32xf32> to vector<8x32xf32>
    %95 = arith.mulf %93, %94 : vector<8x32xf32>
    %96 = vector.broadcast %75 : vector<1x32xf32> to vector<8x32xf32>
    %97 = arith.addf %95, %96 : vector<8x32xf32>
    %c0_33 = arith.constant 0 : index
    %c0_34 = arith.constant 0 : index
    %98 = vector.load %arg9[%c0_33, %c0_34] : memref<96x64xbf16, #tpu.memory_space<vmem>>, vector<96x64xbf16>
    %c0_35 = arith.constant 0 : index
    %c0_36 = arith.constant 0 : index
    %99 = vector.load %arg10[%c0_35, %c0_36] : memref<1x64xf32, #tpu.memory_space<vmem>>, vector<1x64xf32>
    %cst_37 = arith.constant 0.000000e+00 : f32
    %100 = vector.broadcast %cst_37 : f32 to vector<1x32xf32>
    %cst_38 = arith.constant 0.000000e+00 : f32
    %101 = vector.broadcast %cst_38 : f32 to vector<1x32xf32>
    %102 = tpu.concatenate %100, %97, %101 in 0 : vector<1x32xf32>, vector<8x32xf32>, vector<1x32xf32> -> vector<10x32xf32>
    %103 = vector.extract_strided_slice %102 {offsets = [0, 0], sizes = [8, 32], strides = [1, 1]} : vector<10x32xf32> to vector<8x32xf32>
    %104 = vector.extract_strided_slice %102 {offsets = [1, 0], sizes = [8, 32], strides = [1, 1]} : vector<10x32xf32> to vector<8x32xf32>
    %105 = vector.extract_strided_slice %102 {offsets = [2, 0], sizes = [8, 32], strides = [1, 1]} : vector<10x32xf32> to vector<8x32xf32>
    %106 = tpu.concatenate %103, %104, %105 in 1 : vector<8x32xf32>, vector<8x32xf32>, vector<8x32xf32> -> vector<8x96xf32>
    %107 = arith.truncf %106 : vector<8x96xf32> to vector<8x96xbf16>
    %cst_39 = arith.constant dense<0.000000e+00> : vector<8x64xf32>
    %108 = tpu.matmul %107, %98, %cst_39 {dimension_numbers = #tpu.dot_dimension_numbers<[1], [0], [0], [1], [0, 0, 1, 1], [], []>} : vector<8x96xbf16>, vector<96x64xbf16>, vector<8x64xf32> -> vector<8x64xf32>
    %109 = vector.broadcast %99 : vector<1x64xf32> to vector<8x64xf32>
    %110 = arith.addf %108, %109 : vector<8x64xf32>
    %cst_40 = arith.constant 0.000000e+00 : f32
    %111 = vector.broadcast %cst_40 : f32 to vector<8x64xf32>
    %112 = arith.maximumf %110, %111 : vector<8x64xf32>
    %c0_41 = arith.constant 0 : index
    %c0_42 = arith.constant 0 : index
    %113 = vector.load %arg11[%c0_41, %c0_42] : memref<192x32xbf16, #tpu.memory_space<vmem>>, vector<192x32xbf16>
    %c0_43 = arith.constant 0 : index
    %c0_44 = arith.constant 0 : index
    %114 = vector.load %arg12[%c0_43, %c0_44] : memref<1x32xf32, #tpu.memory_space<vmem>>, vector<1x32xf32>
    %cst_45 = arith.constant 0.000000e+00 : f32
    %115 = vector.broadcast %cst_45 : f32 to vector<1x64xf32>
    %cst_46 = arith.constant 0.000000e+00 : f32
    %116 = vector.broadcast %cst_46 : f32 to vector<1x64xf32>
    %117 = tpu.concatenate %115, %112, %116 in 0 : vector<1x64xf32>, vector<8x64xf32>, vector<1x64xf32> -> vector<10x64xf32>
    %118 = vector.extract_strided_slice %117 {offsets = [0, 0], sizes = [8, 64], strides = [1, 1]} : vector<10x64xf32> to vector<8x64xf32>
    %119 = vector.extract_strided_slice %117 {offsets = [1, 0], sizes = [8, 64], strides = [1, 1]} : vector<10x64xf32> to vector<8x64xf32>
    %120 = vector.extract_strided_slice %117 {offsets = [2, 0], sizes = [8, 64], strides = [1, 1]} : vector<10x64xf32> to vector<8x64xf32>
    %121 = tpu.concatenate %118, %119, %120 in 1 : vector<8x64xf32>, vector<8x64xf32>, vector<8x64xf32> -> vector<8x192xf32>
    %122 = arith.truncf %121 : vector<8x192xf32> to vector<8x192xbf16>
    %cst_47 = arith.constant dense<0.000000e+00> : vector<8x32xf32>
    %123 = tpu.matmul %122, %113, %cst_47 {dimension_numbers = #tpu.dot_dimension_numbers<[1], [0], [0], [1], [0, 0, 1, 1], [], []>} : vector<8x192xbf16>, vector<192x32xbf16>, vector<8x32xf32> -> vector<8x32xf32>
    %124 = vector.broadcast %114 : vector<1x32xf32> to vector<8x32xf32>
    %125 = arith.addf %123, %124 : vector<8x32xf32>
    %126 = arith.addf %73, %125 : vector<8x32xf32>
    %c0_48 = arith.constant 0 : index
    %c0_49 = arith.constant 0 : index
    %127 = vector.load %arg13[%c0_48, %c0_49] : memref<8x32xf32, #tpu.memory_space<vmem>>, vector<8x32xf32>
    tpu.vector_store %arg13[%c0_48, %c0_49], %126 {strides = array<i32>} : memref<8x32xf32, #tpu.memory_space<vmem>>, vector<8x32xf32>,
    return
  }
}

</mosaic_0001>

<bundles_post_ra>
// kernel: tpu_custom_call.1
= control target key start
LH: loop header
LB: loop body
LE: loop exit
PB: predicated region body
PF: predicated region fallthrough
CT: control target
= control target key end

     0   :  { %vm49_vm0 = vcmask 261120   ;;  %s1219_s0 = inlined_call_operand.vmem [shape: f32[8,32], index: 0, kind: input, shape index: {}]   ;;  %s1220_s1 = inlined_call_operand.vmem [shape: bf16[32,96], index: 1, kind: input, shape index: {}]   ;;  %s1221_s2 = inlined_call_operand.vmem [shape: f32[1,96], index: 2, kind: input, shape index: {}]   ;;  %s1222_s3 = inlined_call_operand.vmem [shape: bf16[32,32], index: 3, kind: input, shape index: {}]   ;;  %s1223_s4 = inlined_call_operand.vmem [shape: f32[1,32], index: 4, kind: input, shape index: {}]   ;;  %s1224_s5 = inlined_call_operand.vmem [shape: f32[1,32], index: 5, kind: input, shape index: {}]   ;;  %s1225_s6 = inlined_call_operand.vmem [shape: f32[1,32], index: 6, kind: input, shape index: {}]   ;;  %s1226_s7 = inlined_call_operand.vmem [shape: f32[1,32], index: 7, kind: input, shape index: {}]   ;;  %s1227_s8 = inlined_call_operand.vmem [shape: f32[1,32], index: 8, kind: input, shape index: {}]   ;;  %s1228_s9 = inlined_call_operand.vmem [shape: bf16[96,64], index: 9, kind: input, shape index: {}]   ;;  %s1229_s10 = inlined_call_operand.vmem [shape: f32[1,64], index: 10, kind: input, shape index: {}]   ;;  %s1230_s11 = inlined_call_operand.vmem [shape: bf16[192,32], index: 11, kind: input, shape index: {}]   ;;  %s1231_s12 = inlined_call_operand.vmem [shape: f32[1,32], index: 12, kind: input, shape index: {}]   ;;  %s1232_s13 = inlined_call_operand.hbm [shape: f32[8,32], index: 13, kind: output, shape index: {}]  }
   0x1   :  { %v1045_v0 = vld [vmem:[%s1219_s0] sm:$0xff] }
   0x2   :  { %v50_v1 = vsel %vm49_vm0, %v1045_v0, 0.0 }
   0x3   :  { %51 = vadd.xlane.f32.xlu0 %v50_v1 }
   0x4   :  { %18 = vsyncpa [#allocation3], 0  ;;  %v905_v7 = vld [vmem:[%s1220_s1] sm:$0xff]   ;;  %v963_v8 = vmov 0.0   ;;  %vm964_vm1 = vmmov 0   ;;  %v906_v9 = vld [vmem:[%s1220_s1 + $0x8] sm:$0xff]  }
   0x5   :  { %840 = vmatprep.subr.bf16.mxu0 %v963_v8  ;;  %844 = vmatprep.mubr.msk.bf16.mxu0 %vm964_vm1, %v963_v8  ;;  %v781_v14 = vld [vmem:[%s1224_s5] ss:$0 sm:$0xff]  ;;  %s965_s5 = smov 112   ;;  %vm151_vm2 = vcmask 130048   ;;  %vm248_vm3 = vcmask 64512   ;;  %vm278_vm4 = vcmask 1043456  }
   0x6   :  { %841 = vmatpush3.bf16.msra.mxu0 %v905_v7  ;;  %860 = vmatprep.subr.bf16.mxu1 %v963_v8  ;;  %v782_v16 = vld [vmem:[%s1225_s6] ss:$0 sm:$0xff]  ;;  %s966_s6 = smov 96   ;;  %s968_s22 = smov 16   ;;  %vm489_vm5 = vcmask 1040384   ;;  %vm501_vm6 = vcmask 1045504  }
   0x7   :  { %842 = vmatprep.subr.bf16.mxu0 %v963_v8  ;;  %862 = vmatprep.mubr.msk.bf16.mxu1 %vm964_vm1, %v963_v8  ;;  %v783_v20 = vld [vmem:[%s1221_s2] ss:$0 sm:$0xff]  ;;  %s967_s2 = smov 64   ;;  %vm494_vm7 = vcmask 1046528   ;;  %vm509_vm8 = vcmask 523264   ;;  %vm554_vm9 = vcmask 785408  }
   0xa   :  { %843 = vmatpush3.bf16.msra.mxu0 %v906_v9  ;;  %v908_v9 = vld [vmem:[%s1222_s3 + $0x8] sm:$0xff]  }
   0xb   :  { %848 = vmatprep.subr.bf16.mxu0 %v963_v8 }
  0x90   :  { %v52_v2 = vpop.xlane.xlu0 %51 }
  0x91   :  { %v54_v3 = vmul.f32 0.03125, %v52_v2 }
  0x93   :  { %v55_v4 = vsub.f32 %v1045_v0, %v54_v3  ;;  %v907_v3 = vld [vmem:[%s1222_s3] sm:$0xff]  }
  0x95   :  { %v56_v5 = vmul.f32 %v55_v4, %v55_v4 }
  0x97   :  { %v57_v6 = vsel %vm49_vm0, %v56_v5, 0.0 }
  0x98   :  { %58 = vadd.xlane.f32.xlu0 %v57_v6 }
 0x125   :  { %v59_v10 = vpop.xlane.xlu0 %58 }
 0x126   :  { %v60_v11 = vmul.f32 0.03125, %v59_v10 }
 0x128   :  { %v61_v12 = vadd.f32 1e-12, %v60_v11 }
 0x12a   :  { %927 = vrsqrt.f32 %v61_v12 }
 0x134   :  { %v928_v13 = vpop.eup %927 }
 0x135   :  { %v63_v15 = vmul.f32 %v928_v13, %v55_v4 }
 0x137   :  { %v70_v17 = vmul.f32 %v781_v14, %v63_v15 }
 0x139   :  { %v77_v18 = vadd.f32 %v782_v16, %v70_v17 }
 0x13b   :  { %v78_v19 = vpack.c.bf16 %v77_v18, %v77_v18  ;;  %v794_v18 = vld [vmem:[%s1223_s4] ss:$0 sm:$0xff] }
 0x13d   :  { %845 = vmatmul.mubr.msk.bf16.vlgmr.msra.gmra.mrb[0].mxu0 %vm49_vm0, %v78_v19 }
 0x13e   :  { %850 = vmatprep.mubr.msk.bf16.mxu0 %vm964_vm1, %v963_v8 }
 0x210   :  { %v139_v21 = vpop.f32.mrb[0].mxu0 }
 0x211   :  { %v140_v22 = vadd.f32 %v783_v20, %v139_v21  ;;  %v846_v23 = vpop.f32.mrb[1].mxu0 }
 0x212   :  { %v142_v24 = vpop.f32.mrb[2].mxu0 }
 0x213   :  { %v145_v25 = vpack.c.bf16 %v140_v22, %v140_v22  ;;  %v847_v26 = vpop.f32.mrb[3].mxu0 }
 0x215   :  { %147 = vrot.lane.b32.xlu1 %v145_v25, %s965_s5 }
 0x219   :  { %149 = vrot.lane.b32.xlu1 %v145_v25, %s966_s6 }
 0x287   :  { %v148_v27 = vpop.permute.xlu1 %147 }
 0x288   :  { %198 = vrot.lane.b32.xlu0 %v148_v27, %s966_s6 }
 0x28b   :  { %v150_v28 = vpop.permute.xlu1 %149 }
 0x28c   :  { %v156_v29 = vsel %vm151_vm2, %v150_v28, 0 }
 0x28d   :  { %849 = vmatpush3.bf16.xpose.msra.mxu0 %v156_v29 }
 0x28e   :  { %854 = vmatprep.subr.bf16.mxu0 %v963_v8 }
 0x294   :  { %851 = vmatmul.mubr.msk.bf16.vlgmr.msra.gmra.mrb[4].mxu0 %vm151_vm2, %v145_v25 }
 0x295   :  { %856 = vmatprep.mubr.msk.bf16.mxu0 %vm964_vm1, %v963_v8 }
 0x2fa   :  { %v199_v30 = vpop.permute.xlu0 %198 }
 0x2fb   :  { %v204_v31 = vsel %vm151_vm2, %v199_v30, 0  ;;  %v910_v30 = vld [vmem:[%s1228_s9 + $0x8] sm:$0xff]  }
 0x2fc   :  { %855 = vmatpush3.bf16.xpose.msra.mxu0 %v204_v31  ;;  %v911_v31 = vld [vmem:[%s1228_s9 + $0x10] sm:$0xff]  }
 0x2fd   :  { %866 = vmatprep.subr.bf16.mxu0 %v963_v8 }
 0x303   :  { %857 = vmatmul.mubr.msk.bf16.vlgmr.msra.gmra.mrb[8].mxu0 %vm151_vm2, %v148_v27 }
 0x304   :  { %868 = vmatprep.mubr.msk.bf16.mxu0 %vm964_vm1, %v963_v8 }
 0x367   :  { %v192_v32 = vpop.f32.mrb[4].mxu0 }
 0x368   :  { %v246_v33 = vmul.f32 0.25, %v192_v32  ;;  %v852_v34 = vpop.f32.mrb[5].mxu0  ;;  %v912_v32 = vld [vmem:[%s1228_s9 + $0x18] sm:$0xff]  }
 0x369   :  { %v195_v35 = vpop.f32.mrb[6].mxu0 }
 0x36a   :  { %v853_v36 = vpop.f32.mrb[7].mxu0  ;;  %v249_v37 = vsel %vm248_vm3, %v246_v33, -inf }
 0x36b   :  { %250 = vmax.xlane.f32.xlu0 %v249_v37  ;;  %v914_v37 = vld [vmem:[%s1228_s9 + $0x28] sm:$0xff]  }
 0x3d6   :  { %v240_v38 = vpop.f32.mrb[8].mxu0 }
 0x3d7   :  { %v247_v39 = vmul.f32 0.25, %v240_v38  ;;  %v858_v40 = vpop.f32.mrb[9].mxu0 }
 0x3d8   :  { %v243_v41 = vpop.f32.mrb[10].mxu0 }
 0x3d9   :  { %v859_v42 = vpop.f32.mrb[11].mxu0  ;;  %v252_v43 = vsel %vm248_vm3, %v247_v39, -inf  ;;  %v796_v41 = vld [vmem:[%s1227_s8] ss:$0 sm:$0xff]  ;;  %s971_s8 = smov [#allocation2]  }
 0x3da   :  { %253 = vmax.xlane.f32.xlu1 %v252_v43 }
 0x3f8   :  { %v251_v44 = vpop.xlane.xlu0 %250 }
 0x3f9   :  { %v255_v45 = vsub.f32 %v246_v33, %v251_v44  ;;  %v913_v33 = vld [vmem:[%s1228_s9 + $0x20] sm:$0xff]  }
 0x3fb   :  { %v257_v46 = vmul.f32 1.442695, %v255_v45 }
 0x3fd   :  { %929 = vpow2.f32 %v257_v46 }
 0x407   :  { %v930_v47 = vpop.eup %929 }
 0x408   :  { %v261_v48 = vsel %vm248_vm3, %v930_v47, 0.0 }
 0x409   :  { %262 = vadd.xlane.f32.xlu0 %v261_v48 }
 0x41f   :  { %273 = vrot.lane.b32.xlu0 %v145_v25, %s967_s2 }
 0x467   :  { %v254_v49 = vpop.xlane.xlu1 %253 }
 0x468   :  { %v256_v50 = vsub.f32 %v247_v39, %v254_v49  ;;  %v795_v39 = vld [vmem:[%s1226_s7] ss:$0 sm:$0xff]  ;;  %s969_s7 = smov 32  }
 0x46a   :  { %v259_v51 = vmul.f32 1.442695, %v256_v50 }
 0x46c   :  { %931 = vpow2.f32 %v259_v51 }
 0x476   :  { %v932_v52 = vpop.eup %931 }
 0x477   :  { %v264_v53 = vsel %vm248_vm3, %v932_v52, 0.0 }
 0x478   :  { %265 = vadd.xlane.f32.xlu1 %v264_v53 }
 0x489   :  { %322 = vrot.lane.b32.xlu1 %v148_v27, %s967_s2 }
 0x496   :  { %v263_v54 = vpop.xlane.xlu0 %262 }
 0x497   :  { %933 = vrcp.f32 %v263_v54 }
 0x49a   :  { %v274_v55 = vpop.permute.xlu0 %273 }
 0x49b   :  { %v280_v56 = vsel %vm278_vm4, %v274_v55, 0 }
 0x49c   :  { %861 = vmatpush3.bf16.msra.mxu1 %v280_v56 }
 0x49d   :  { %872 = vmatprep.subr.bf16.mxu1 %v963_v8 }
 0x4a1   :  { %v934_v57 = vpop.eup %933 }
 0x4a2   :  { %v269_v58 = vmul.f32 %v934_v57, %v930_v47  ;;  %v915_v57 = vld [vmem:[%s1230_s11] sm:$0xff]  }
 0x4a4   :  { %v271_v59 = vpack.c.bf16 %v269_v58, %v269_v58  ;;  %v970_v58 = vmov 0  }
 0x4a6   :  { %863 = vmatmul.mubr.msk.bf16.vlgmr.msra.gmra.mrb[0].mxu1 %vm248_vm3, %v271_v59  ;;  %v916_v59 = vld [vmem:[%s1230_s11 + $0x8] sm:$0xff]  }
 0x4a7   :  { %876 = vmatprep.mubr.msk.bf16.mxu1 %vm964_vm1, %v963_v8  ;;  %873 = vmatpush3.bf16.msra.mxu1 %v907_v3  ;;  %v923_v3 = vld [vmem:[%s1230_s11 + $0x40] sm:$0xff]  }
 0x4a8   :  { %874 = vmatprep.subr.bf16.mxu1 %v963_v8 }
 0x4ab   :  { %875 = vmatpush3.bf16.msra.mxu1 %v908_v9 }
 0x4ac   :  { %725 = vmatprep.subr.bf16.mxu1 %v970_v58 }
 0x505   :  { %v266_v60 = vpop.xlane.xlu1 %265 }
 0x506   :  { %935 = vrcp.f32 %v266_v60  ;;  %v917_v60 = vld [vmem:[%s1230_s11 + $0x10] sm:$0xff]  }
 0x509   :  { %v323_v61 = vpop.permute.xlu1 %322 }
 0x50a   :  { %v328_v62 = vsel %vm278_vm4, %v323_v61, 0  ;;  %v918_v61 = vld [vmem:[%s1230_s11 + $0x18] sm:$0xff]  }
 0x50b   :  { %867 = vmatpush3.bf16.msra.mxu0 %v328_v62  ;;  %v919_v62 = vld [vmem:[%s1230_s11 + $0x20] sm:$0xff]  }
 0x50c   :  { %880 = vmatprep.subr.bf16.mxu0 %v963_v8 }
 0x510   :  { %v936_v63 = vpop.eup %935 }
 0x511   :  { %v270_v1 = vmul.f32 %v936_v63, %v932_v52  ;;  %v920_v63 = vld [vmem:[%s1230_s11 + $0x28] sm:$0xff]  }
 0x513   :  { %v272_v2 = vpack.c.bf16 %v270_v1, %v270_v1  ;;  %v921_v1 = vld [vmem:[%s1230_s11 + $0x30] sm:$0xff]  }
 0x515   :  { %869 = vmatmul.mubr.msk.bf16.vlgmr.msra.gmra.mrb[12].mxu0 %vm248_vm3, %v272_v2  ;;  %v922_v2 = vld [vmem:[%s1230_s11 + $0x38] sm:$0xff]  }
 0x516   :  { %892 = vmatprep.mubr.msk.bf16.mxu0 %vm964_vm1, %v963_v8 }
 0x579   :  { %v316_v4 = vpop.f32.mrb[0].mxu1 }
 0x57a   :  { %v864_v5 = vpop.f32.mrb[1].mxu1 }
 0x57b   :  { %v319_v6 = vpop.f32.mrb[2].mxu1  ;;  %v925_v5 = vld [vmem:[%s1230_s11 + $0x50] sm:$0xff]  }
 0x57c   :  { %v865_v7 = vpop.f32.mrb[3].mxu1  ;;  %v926_v6 = vld [vmem:[%s1230_s11 + $0x58] sm:$0xff]  }
 0x57d   :  { %v797_v7 = vld [vmem:[%s1229_s10] ss:$0 sm:$0xff] }
 0x5e8   :  { %v364_v10 = vpop.f32.mrb[12].mxu0 }
 0x5e9   :  { %371 = vrot.lane.b32.xlu1 %v364_v10, %s968_s22  ;;  %v870_v11 = vpop.f32.mrb[13].mxu0 }
 0x5ea   :  { %v367_v12 = vpop.f32.mrb[14].mxu0 }
 0x5eb   :  { %v871_v13 = vpop.f32.mrb[15].mxu0 }
 0x65b   :  { %v372_v14 = vpop.permute.xlu1 %371 }
 0x65c   :  { %v374_v15 = vsel %vm151_vm2, %v316_v4, %v372_v14  ;;  %v924_v4 = vld [vmem:[%s1230_s11 + $0x48] sm:$0xff]  }
 0x65d   :  { %v375_v16 = vpack.c.bf16 %v374_v15, %v374_v15 }
 0x65f   :  { %877 = vmatmul.mubr.msk.bf16.vlgmr.msra.gmra.mrb[4].mxu1 %vm49_vm0, %v375_v16 }
 0x660   :  { %726 = vmatpush1.bf16.msra.mxu1 %v915_v57 }
 0x661   :  { %727 = vmatprep.subr.bf16.mxu1 %v970_v58 }
 0x664   :  { %728 = vmatpush1.bf16.msra.mxu1 %v916_v59 }
 0x665   :  { %729 = vmatprep.subr.bf16.mxu1 %v970_v58 }
 0x668   :  { %730 = vmatpush1.bf16.msra.mxu1 %v917_v60 }
 0x669   :  { %731 = vmatprep.subr.bf16.mxu1 %v970_v58 }
 0x66c   :  { %732 = vmatpush1.bf16.msra.mxu1 %v918_v61 }
 0x66d   :  { %733 = vmatprep.subr.bf16.mxu1 %v970_v58 }
 0x670   :  { %734 = vmatpush1.bf16.msra.mxu1 %v919_v62 }
 0x671   :  { %735 = vmatprep.subr.bf16.mxu1 %v970_v58 }
 0x674   :  { %736 = vmatpush1.bf16.msra.mxu1 %v920_v63 }
 0x675   :  { %737 = vmatprep.subr.bf16.mxu1 %v970_v58 }
 0x678   :  { %738 = vmatpush1.bf16.msra.mxu1 %v921_v1 }
 0x679   :  { %739 = vmatprep.subr.bf16.mxu1 %v970_v58 }
 0x67c   :  { %740 = vmatpush1.bf16.msra.mxu1 %v922_v2 }
 0x67d   :  { %741 = vmatprep.subr.bf16.mxu1 %v970_v58 }
 0x680   :  { %742 = vmatpush1.bf16.msra.mxu1 %v923_v3 }
 0x681   :  { %743 = vmatprep.subr.bf16.mxu1 %v970_v58 }
 0x684   :  { %744 = vmatpush1.bf16.msra.mxu1 %v924_v4 }
 0x685   :  { %745 = vmatprep.subr.bf16.mxu1 %v970_v58 }
 0x688   :  { %746 = vmatpush1.bf16.msra.mxu1 %v925_v5 }
 0x689   :  { %747 = vmatprep.subr.bf16.mxu1 %v970_v58 }
 0x68c   :  { %748 = vmatpush1.bf16.msra.mxu1 %v926_v6 }
 0x732   :  { %v429_v17 = vpop.f32.mrb[4].mxu1 }
 0x733   :  { %v435_v19 = vadd.f32 %v429_v17, %v1045_v0  ;;  %v878_v20 = vpop.f32.mrb[5].mxu1  ;;  %v909_v0 = vld [vmem:[%s1228_s9] sm:$0xff]   ;;  %s773_s9 = sshll.u32 %s971_s8, 4  ;;  %s774_s9 = int_to_ptr.vmem [resolvable:$true] %s773_s9 }
 0x734   :  { %v432_v21 = vpop.f32.mrb[6].mxu1  ;;  %881 = vmatpush3.bf16.msra.mxu0 %v909_v0  ;;  %p944_p1 = scmp.lt.s32.totalorder %s774_s9, %s774_s9 }
 0x735   :  { %v1114_v22 = vadd.f32 %v794_v18, %v435_v19  ;;  %v879_v23 = vpop.f32.mrb[7].mxu1  ;;  %882 = vmatprep.subr.bf16.mxu0 %v963_v8 }
 0x737   :  { %v446_v24 = vsel %vm49_vm0, %v1114_v22, 0.0 }
 0x738   :  { %447 = vadd.xlane.f32.xlu1 %v446_v24  ;;  %883 = vmatpush3.bf16.msra.mxu0 %v910_v30 }
 0x739   :  { %884 = vmatprep.subr.bf16.mxu0 %v963_v8 }
 0x73c   :  { %885 = vmatpush3.bf16.msra.mxu0 %v911_v31 }
 0x73d   :  { %886 = vmatprep.subr.bf16.mxu0 %v963_v8 }
 0x740   :  { %887 = vmatpush3.bf16.msra.mxu0 %v912_v32 }
 0x741   :  { %888 = vmatprep.subr.bf16.mxu0 %v963_v8 }
 0x744   :  { %889 = vmatpush3.bf16.msra.mxu0 %v913_v33 }
 0x745   :  { %890 = vmatprep.subr.bf16.mxu0 %v963_v8 }
 0x748   :  { %891 = vmatpush3.bf16.msra.mxu0 %v914_v37 }
 0x7c5   :  { %v448_v25 = vpop.xlane.xlu1 %447 }
 0x7c6   :  { %v449_v26 = vmul.f32 0.03125, %v448_v25 }
 0x7c8   :  { %v450_v27 = vsub.f32 %v1114_v22, %v449_v26 }
 0x7ca   :  { %v451_v28 = vmul.f32 %v450_v27, %v450_v27 }
 0x7cc   :  { %v452_v29 = vsel %vm49_vm0, %v451_v28, 0.0 }
 0x7cd   :  { %453 = vadd.xlane.f32.xlu0 %v452_v29  ;;  %v805_v29 = vld [vmem:[%s1231_s12] ss:$0 sm:$0xff] }
 0x85a   :  { %v454_v34 = vpop.xlane.xlu0 %453 }
 0x85b   :  { %v455_v35 = vmul.f32 0.03125, %v454_v34 }
 0x85d   :  { %v456_v36 = vadd.f32 1e-12, %v455_v35 }
 0x85f   :  { %937 = vrsqrt.f32 %v456_v36 }
 0x869   :  { %v938_v38 = vpop.eup %937 }
 0x86a   :  { %v458_v40 = vmul.f32 %v938_v38, %v450_v27 }
 0x86c   :  { %v465_v8 = vmul.f32 %v795_v39, %v458_v40 }
 0x86e   :  { %v472_v42 = vadd.f32 %v796_v41, %v465_v8 }
 0x870   :  { %v487_v43 = vrot.slane %v472_v42, 7 }
 0x872   :  { %v490_v44 = vsel %vm489_vm5, 0.0, %v487_v43  ;;  %v491_v45 = vsel %vm489_vm5, %v487_v43, 0.0 }
 0x873   :  { %v502_v46 = vrot.slane %v490_v44, 2  ;;  %v503_v47 = vrot.slane %v491_v45, 2  ;;  %v495_v48 = vrot.slane %v490_v44, 1  ;;  %v496_v49 = vrot.slane %v491_v45, 1 }
 0x875   :  { %v504_v50 = vsel %vm501_vm6, %v502_v46, %v503_v47  ;;  %v497_v51 = vsel %vm494_vm7, %v495_v48, %v496_v49 }
 0x876   :  { %505 = vrot.lane.b32.xlu0 %v504_v50, %s967_s2  ;;  %498 = vrot.lane.b32.xlu1 %v497_v51, %s969_s7 }
 0x8e8   :  { %v506_v52 = vpop.permute.xlu0 %505  ;;  %v499_v53 = vpop.permute.xlu1 %498 }
 0x8e9   :  { %v508_v54 = vsel %vm49_vm0, %v490_v44, %v499_v53 }
 0x8ea   :  { %v510_v55 = vsel %vm509_vm8, %v508_v54, %v506_v52 }
 0x8eb   :  { %v511_v56 = vpack.c.bf16 %v510_v55, %v510_v55 }
 0x8ed   :  { %893 = vmatmul.mubr.msk.bf16.vlgmr.msra.gmra.mrb[16].mxu0 %vm554_vm9, %v511_v56 }
 0x9c0   :  { %v592_v9 = vpop.f32.mrb[16].mxu0 }
 0x9c1   :  { %v593_v10 = vadd.f32 %v797_v7, %v592_v9  ;;  %v894_v11 = vpop.f32.mrb[17].mxu0 }
 0x9c2   :  { %v595_v12 = vpop.f32.mrb[18].mxu0 }
 0x9c3   :  { %v598_v13 = vmax.f32 %v593_v10, 0.0  ;;  %v895_v14 = vpop.f32.mrb[19].mxu0 }
 0x9c5   :  { %v625_v15 = vrot.slane %v598_v13, 7 }
 0x9c7   :  { %v627_v16 = vsel %vm489_vm5, 0.0, %v625_v15  ;;  %v628_v17 = vsel %vm489_vm5, %v625_v15, 0.0 }
 0x9c8   :  { %v631_v18 = vrot.slane %v627_v16, 1  ;;  %v632_v19 = vrot.slane %v628_v17, 1  ;;  %v637_v20 = vrot.slane %v627_v16, 2  ;;  %v638_v21 = vrot.slane %v628_v17, 2 }
 0x9ca   :  { %v633_v23 = vsel %vm494_vm7, %v631_v18, %v632_v19  ;;  %v639_v24 = vsel %vm501_vm6, %v637_v20, %v638_v21 }
 0x9cb   :  { %634 = vrot.lane.b32.xlu1 %v633_v23, %s967_s2  ;;  %v643_v25 = vpack.c.bf16 %v639_v24, %v639_v24  ;;  %s939_s2 = scalar_lea.vmem %s774_s9, 128 }
 0x9cc   :  { %p940_p0 = scmp.ne.s32.totalorder %s774_s9, %s939_s2  ;;  %p945_p2 = scmp.lt.s32.totalorder %s939_s2, %s939_s2 }
 0x9cd   :  { %818 = vmatprep.mubr.msk.bf16.mxu1 %vm509_vm8, %v643_v25 }
 0x9ce   :  { %p946_p3 = por %p945_p2, %p944_p1 }
 0x9d0   :  { %p947_p4 = pnand %p946_p3, %p940_p0 }
 0xa3d   :  { %v635_v26 = vpop.permute.xlu1 %634 }
 0xa3e   :  { %v641_v27 = vsel %vm509_vm8, %v627_v16, %v635_v26 }
 0xa3f   :  { %v642_v28 = vpack.c.bf16 %v641_v27, %v641_v27 }
 0xa41   :  { %758 = vmatmul.mubr.bf16.vlgmr.msra.gmra.mrb[8].mxu1 %v642_v28 }
 0xb14   :  { %v759_v0 = vpop.f32.mrb[8].mxu1 }
 0xb15   :  { %v760_v30 = vadd.f32 %v805_v29, %v759_v0  ;;  %v761_v31 = vpop.f32.mrb[9].mxu1 }
 0xb16   :  { %v762_v32 = vpop.f32.mrb[10].mxu1 }
 0xb17   :  { %v765_v33 = vadd.f32 %v760_v30, %v1114_v22  ;;  %v763_v34 = vpop.f32.mrb[11].mxu1 }
 0xb19   :  { %766 = vst.msk [vmem:[#allocation2] sm:$0xff] %vm49_vm0, %v765_v33 }
 0xb1a   :  { %950 = shalt.err (!%p947_p4)
}
 0xb1b   :  { %s951_s19 = scalar_lea.hbm %s1232_s13, 128 }
 0xb1c   :  { %p952_p5 = scmp.ne.s32.totalorder %s1232_s13, %s951_s19  ;;  %p955_p6 = scmp.lt.u32.totalorder %s951_s19, %s1232_s13 }
 0xb1e   :  { %p957_p7 = pnand %p955_p6, %p952_p5 }
 0xb20   :  { %960 = shalt.err (!%p957_p7)
}
 0xb21   :  { %776 = dma.vmem_to_hbm [thread:$0]  %s774_s9, 128, %s1232_s13, [#allocation3]  }
 0xb22   :  { %961 = dma.done.wait [#allocation3], 128  }
 0xb23   :  { %962 = vsyncadd [#allocation3], 4294967168 }
 0xb24   :  { %780 = vsyncpa [#allocation3], 1 }

</bundles_post_ra>
